<compile_context>
chip_gen: v7x
topology: tpu7x:2x2x1
jax: 0.10.0
libtpu: 0.0.40
codegen_flags: <defaults>
</compile_context>

<pallas_src>
import jax
import jax.numpy as jnp
from jax import lax
from jax.experimental import pallas as pl
from jax.experimental.pallas import tpu as pltpu


def _round_up(x, m):
    return (x + m - 1) // m * m


def neighbor_decoder_kernel(x_ref, e_ref, b_ref, o_ref):
    # x_ref: (tb, D)   e_ref: (tn, D)   b_ref: (1, tn)   o_ref: (tb, tn)
    # Contract the last dim of both operands -> no explicit e.T in the kernel.
    logits = lax.dot_general(
        x_ref[...],
        e_ref[...],
        dimension_numbers=(((1,), (1,)), ((), ())),
        preferred_element_type=jnp.float32,
    )
    # tanh runs on the (single-slot) EUP; f32 tanh is correct on all of
    # v5e/v6e/v7x.  Cast to the output dtype on store.
    o_ref[...] = jnp.tanh(logits + b_ref[...]).astype(o_ref.dtype)


def neighbor_decoder(
    x,
    ent_embs,
    bias,
    *,
    stream_dtype=jnp.bfloat16,
    out_dtype=None,
    max_tb=512,
    max_tn=2048,
):
    """tanh(x @ ent_embs.T + bias) on the MXU via Pallas.

    stream_dtype: dtype the matmul operands are streamed from HBM in
      (f32 accumulation either way).  None -> keep the input dtype.
    """
    B, D = x.shape
    N, D2 = ent_embs.shape
    assert D == D2 and bias.shape == (N,)

    if stream_dtype is None:
        stream_dtype = x.dtype
    if out_dtype is None:
        out_dtype = x.dtype

    # Cast only if needed (callers holding bf16 embeddings pay nothing here).
    x_s = x if x.dtype == stream_dtype else x.astype(stream_dtype)
    e_s = ent_embs if ent_embs.dtype == stream_dtype else ent_embs.astype(stream_dtype)
    b_s = bias.astype(jnp.float32).reshape(1, N)

    # --- tile selection (no padding: full-dim blocks or 128-aligned blocks,
    # boundary blocks handled by Pallas masking) -----------------------------
    if B <= max_tb:
        tb = B                       # whole batch resident: x block index is
    else:                            # constant, so x is DMA'd once total.
        tb = max_tb                  # 512 is a multiple of 8/16/32 sublanes.

    if N > max_tn:
        tn = max_tn                  # multiple of 128.
    elif N >= 2048:
        # Split the entity axis into >=2 blocks so v7x's two TensorCores each
        # stream a disjoint chunk of ent_embs.
        tn = _round_up(pl.cdiv(N, 2), 128)
    else:
        tn = N                       # full-dim block, always layout-legal.

    grid = (pl.cdiv(N, tn), pl.cdiv(B, tb))   # entity axis OUTER.

    # --- VMEM budget: double-buffered input/output tiles + f32 logits, 2x
    # headroom, clamped to <=48 MiB (safe on v7x's 64 MiB physical VMEM). -----
    s_sz = jnp.dtype(stream_dtype).itemsize
    o_sz = jnp.dtype(out_dtype).itemsize
    tile_bytes = (
        2 * (tb * D * s_sz + tn * D * s_sz + tn * 4 + tb * tn * o_sz)
        + tb * tn * 4
    )
    vmem_limit = int(min(max(2 * tile_bytes, 16 * 1024 * 1024), 48 * 1024 * 1024))

    cost = pl.CostEstimate(
        flops=2 * B * N * D,
        transcendentals=B * N,
        bytes_accessed=(N * D + B * D) * s_sz + N * 4 + B * N * o_sz,
    )

    out = pl.pallas_call(
        neighbor_decoder_kernel,
        out_shape=jax.ShapeDtypeStruct((B, N), out_dtype),
        grid_spec=pltpu.PrefetchScalarGridSpec(
            num_scalar_prefetch=0,
            grid=grid,
            in_specs=[
                pl.BlockSpec((tb, D), lambda j, i: (i, 0)),   # x tile
                pl.BlockSpec((tn, D), lambda j, i: (j, 0)),   # ent_embs tile
                pl.BlockSpec((1, tn), lambda j, i: (0, j)),   # bias tile
            ],
            out_specs=pl.BlockSpec((tb, tn), lambda j, i: (i, j)),
        ),
        compiler_params=pltpu.CompilerParams(
            dimension_semantics=("parallel", "parallel"),
            vmem_limit_bytes=vmem_limit,
        ),
        cost_estimate=cost,
    )(x_s, e_s, b_s)

    return out


if __name__ == "__main__":
    # Small shapes consistent with the module; B / N_ENT intentionally not
    # multiples of (8, 128) to exercise the masked-boundary-block path.
    B, SUB_DIM, N_ENT = 10, 128, 300

    key = jax.random.PRNGKey(0)
    kx, ke = jax.random.split(key)
    x = jax.random.normal(kx, (B, SUB_DIM), dtype=jnp.float32)
    ent_embs = jax.random.normal(ke, (N_ENT, SUB_DIM), dtype=jnp.float32) * 0.1
    bias = jnp.zeros((N_ENT,), dtype=jnp.float32)  # nn.Parameter(torch.zeros(...))

    # 1) Default (bf16-streamed) path vs. a reference using the same bf16
    #    operand values (errors beyond that are only accumulation-order noise).
    out_bf16 = jax.block_until_ready(neighbor_decoder(x, ent_embs, bias))
    x_b = x.astype(jnp.bfloat16).astype(jnp.float32)
    e_b = ent_embs.astype(jnp.bfloat16).astype(jnp.float32)
    ref_bf16 = jnp.tanh(x_b @ e_b.T + bias)
    assert out_bf16.shape == (B, N_ENT)
    assert jnp.allclose(out_bf16, ref_bf16, atol=2e-2, rtol=2e-2)

    # 2) Exact-f32 streaming path vs. plain-JAX f32 reference.
    out_f32 = jax.block_until_ready(
        neighbor_decoder(x, ent_embs, bias, stream_dtype=None)
    )
    ref_f32 = jnp.tanh(x @ ent_embs.T + bias)
    assert out_f32.shape == (B, N_ENT)
    assert jnp.allclose(out_f32, ref_f32, atol=1e-5, rtol=1e-5)

    print("KERNEL_OK")
</pallas_src>

<mosaic_0001>
module attributes {stable_mosaic.version = 11 : i64} {
  func.func @neighbor_decoder_kernel(%arg0: i32, %arg1: i32, %arg2: memref<10x128xbf16, #tpu.memory_space<vmem>>, %arg3: memref<300x128xbf16, #tpu.memory_space<vmem>>, %arg4: memref<1x300xf32, #tpu.memory_space<vmem>>, %arg5: memref<10x300xf32, #tpu.memory_space<vmem>>) attributes {dimension_semantics = [#tpu.dimension_semantics<parallel>, #tpu.dimension_semantics<parallel>], iteration_bounds = array<i64: 1, 1>, scalar_prefetch = 0 : i64, scratch_operands = 0 : i64, tpu.core_type = #tpu.core_type<tc>, window_params = [{transform_indices = @transform_0, window_bounds = array<i64: 10, 128>}, {transform_indices = @transform_1, window_bounds = array<i64: 300, 128>}, {transform_indices = @transform_2, window_bounds = array<i64: 1, 300>}, {transform_indices = @transform_3, window_bounds = array<i64: 10, 300>}]} {
    %c0 = arith.constant 0 : index
    %c0_0 = arith.constant 0 : index
    %0 = vector.load %arg2[%c0, %c0_0] : memref<10x128xbf16, #tpu.memory_space<vmem>>, vector<10x128xbf16>
    %c0_1 = arith.constant 0 : index
    %c0_2 = arith.constant 0 : index
    %1 = vector.load %arg3[%c0_1, %c0_2] : memref<300x128xbf16, #tpu.memory_space<vmem>>, vector<300x128xbf16>
    %cst = arith.constant dense<0.000000e+00> : vector<10x300xf32>
    %2 = tpu.matmul %0, %1, %cst {dimension_numbers = #tpu.dot_dimension_numbers<[1], [1], [0], [0], [0, 0, 1, 0], [], []>} : vector<10x128xbf16>, vector<300x128xbf16>, vector<10x300xf32> -> vector<10x300xf32>
    %c0_3 = arith.constant 0 : index
    %c0_4 = arith.constant 0 : index
    %3 = vector.load %arg4[%c0_3, %c0_4] : memref<1x300xf32, #tpu.memory_space<vmem>>, vector<1x300xf32>
    %4 = vector.broadcast %3 : vector<1x300xf32> to vector<10x300xf32>
    %5 = arith.addf %2, %4 : vector<10x300xf32>
    %6 = math.tanh %5 : vector<10x300xf32>
    %c0_5 = arith.constant 0 : index
    %c0_6 = arith.constant 0 : index
    %7 = vector.load %arg5[%c0_5, %c0_6] : memref<10x300xf32, #tpu.memory_space<vmem>>, vector<10x300xf32>
    tpu.vector_store %arg5[%c0_5, %c0_6], %6 {strides = array<i32>} : memref<10x300xf32, #tpu.memory_space<vmem>>, vector<10x300xf32>,
    return
  }
  func.func @transform_0(%arg0: i32, %arg1: i32) -> (i32, i32) {
    %c0_i32 = arith.constant 0 : i32
    %c0_i32_0 = arith.constant 0 : i32
    return %arg1, %c0_i32 : i32, i32
  }
  func.func @transform_1(%arg0: i32, %arg1: i32) -> (i32, i32) {
    %c0_i32 = arith.constant 0 : i32
    %c0_i32_0 = arith.constant 0 : i32
    return %arg0, %c0_i32 : i32, i32
  }
  func.func @transform_2(%arg0: i32, %arg1: i32) -> (i32, i32) {
    %c0_i32 = arith.constant 0 : i32
    %c0_i32_0 = arith.constant 0 : i32
    return %c0_i32, %arg0 : i32, i32
  }
  func.func @transform_3(%arg0: i32, %arg1: i32) -> (i32, i32) {
    %c0_i32 = arith.constant 0 : i32
    return %arg1, %arg0 : i32, i32
  }
}

</mosaic_0001>

<bundles_post_ra>
// kernel: tpu_custom_call.1
= control target key start
LH: loop header
LB: loop body
LE: loop exit
PB: predicated region body
PF: predicated region fallthrough
CT: control target
= control target key end

     0   :  { %8 = vsyncpa [#allocation3], 0  ;;  %s570_s0 = inlined_call_operand.hbm [shape: bf16[10,128], index: 0, kind: input, shape index: {}]   ;;  %s571_s1 = inlined_call_operand.hbm [shape: bf16[300,128], index: 1, kind: input, shape index: {}]   ;;  %s572_s2 = inlined_call_operand.vmem [shape: f32[1,300], index: 2, kind: input, shape index: {}]   ;;  %s573_s3 = inlined_call_operand.hbm [shape: f32[10,300], index: 3, kind: output, shape index: {}]  }
   0x1   :  { %9 = vsyncpa [#allocation6], 0 }
   0x2   :  { %10 = vsyncpa [#allocation4], 0  ;;  %s502_s12 = smov [#allocation2]   ;;  %s430_s16 = scalar_lea.hbm %s570_s0, 128 }
   0x3   :  { %s16_s13 = sshll.u32 %s502_s12, 4  ;;  %p431_p0 = scmp.ne.s32.totalorder %s570_s0, %s430_s16  ;;  %s17_s13 = int_to_ptr.vmem [resolvable:$true] %s16_s13 }
   0x4   :  { %p434_p1 = scmp.lt.u32.totalorder %s430_s16, %s570_s0 }
   0x6   :  { %p436_p2 = pnand %p434_p1, %p431_p0 }
   0x8   :  { %439 = shalt.err (!%p436_p2)
}
   0x9   :  { %s440_s21 = scalar_lea.vmem %s17_s13, 128  ;;  %p445_p4 = scmp.lt.s32.totalorder %s17_s13, %s17_s13 }
   0xa   :  { %p441_p3 = scmp.ne.s32.totalorder %s17_s13, %s440_s21  ;;  %p446_p5 = scmp.lt.s32.totalorder %s440_s21, %s440_s21 }
   0xc   :  { %p447_p6 = por %p446_p5, %p445_p4 }
   0xe   :  { %p448_p7 = pnand %p447_p6, %p441_p3 }
  0x10   :  { %451 = shalt.err (!%p448_p7)
}
  0x11   :  { %s503_s22 = smov 64   ;;  %s504_s23 = smov 4  }
  0x12   :  { %22 = dma.hbm_to_vmem [thread:$0]  %s570_s0, 128, %s17_s13, [#allocation3], %s503_s22, %s503_s22, %s504_s23  }
  0x13   :  { %s505_s26 = smov [#allocation5]   ;;  %s452_s30 = scalar_lea.hbm %s571_s1, 2432 }
  0x14   :  { %s28_s27 = sshll.u32 %s505_s26, 4  ;;  %p453_p8 = scmp.ne.s32.totalorder %s571_s1, %s452_s30  ;;  %s29_s27 = int_to_ptr.vmem [resolvable:$true] %s28_s27 }
  0x15   :  { %p456_p9 = scmp.lt.u32.totalorder %s452_s30, %s571_s1 }
  0x17   :  { %p458_p10 = pnand %p456_p9, %p453_p8 }
  0x19   :  { %461 = shalt.err (!%p458_p10)
}
  0x1a   :  { %s462_s8 = scalar_lea.vmem %s29_s27, 2432  ;;  %p467_p12 = scmp.lt.s32.totalorder %s29_s27, %s29_s27 }
  0x1b   :  { %p463_p11 = scmp.ne.s32.totalorder %s29_s27, %s462_s8  ;;  %p468_p13 = scmp.lt.s32.totalorder %s462_s8, %s462_s8 }
  0x1d   :  { %p469_p0 = por %p468_p13, %p467_p12 }
  0x1f   :  { %p470_p1 = pnand %p469_p0, %p463_p11 }
  0x21   :  { %473 = shalt.err (!%p470_p1)
}
  0x22   :  { %34 = dma.hbm_to_vmem [thread:$0]  %s571_s1, 2432, %s29_s27, [#allocation6], %s503_s22, %s503_s22, %s504_s23  }
  0x23   :  { %496 = dma.done.wait [#allocation3], 128  }
  0x24   :  { %497 = vsyncadd [#allocation3], 4294967168 }
  0x25   :  { %498 = dma.done.wait [#allocation6], 2432  }
  0x26   :  { %499 = vsyncadd [#allocation6], 4294964864  ;;  %v506_v0 = vmov 0.0   ;;  %vm507_vm0 = vmmov 0   ;;  %v398_v1 = vld [vmem:[#allocation5 + $0x40] sm:$0xff]   ;;  %v400_v3 = vld [vmem:[#allocation5 + $0x48] sm:$0xff]   ;;  %v86_v21 = vlaneseq }
  0x27   :  { %379 = vmatprep.subr.bf16.mxu1 %v506_v0  ;;  %385 = vmatprep.mubr.msk.bf16.mxu1 %vm507_vm0, %v506_v0  ;;  %v399_v2 = vld [vmem:[#allocation5] sm:$0xff]   ;;  %v401_v4 = vld [vmem:[#allocation5 + $0x8] sm:$0xff]   ;;  %v402_v5 = vld [vmem:[#allocation5 + $0x50] sm:$0xff]   ;;  %vm313_vm1 = vcmask 359424   ;;  %vm317_vm2 = vcmask 353280  }
  0x28   :  { %357 = vmatprep.subr.bf16.mxu0 %v398_v1  ;;  %v408_v6 = vld [vmem:[#allocation5 + $0x80] sm:$0xff]   ;;  %v403_v7 = vld [vmem:[#allocation5 + $0x10] sm:$0xff]   ;;  %v404_v8 = vld [vmem:[#allocation5 + $0x58] sm:$0xff]   ;;  %v87_v22 = vshrl.u32 %v86_v21, 7 }
  0x29   :  { %358 = vmatpush3.bf16.xpose.msra.mxu0 %v399_v2  ;;  %380 = vmatpush3.bf16.xpose.msra.mxu1 %v408_v6  ;;  %v411_v9 = vld [vmem:[#allocation5 + $0x88] sm:$0xff]   ;;  %v417_v10 = vld [vmem:[#allocation2] sm:$0x1f]   ;;  %v406_v12 = vld [vmem:[#allocation5 + $0x60] sm:$0xff]  }
  0x2a   :  { %359 = vmatprep.subr.bf16.mxu0 %v400_v3  ;;  %381 = vmatprep.subr.bf16.mxu1 %v506_v0  ;;  %v405_v11 = vld [vmem:[#allocation5 + $0x18] sm:$0xff]   ;;  %v414_v13 = vld [vmem:[#allocation5 + $0x90] sm:$0x3f]   ;;  %v407_v14 = vld [vmem:[#allocation5 + $0x20] sm:$0xff]   ;;  %v96_v23 = vsub.s32 2, %v87_v22  ;;  %v88_v34 = vsub.s32 0, %v87_v22 }
  0x2b   :  { %373 = vmatprep.mubr.bf16.mxu0 %v417_v10  ;;  %v409_v15 = vld [vmem:[#allocation5 + $0x68] sm:$0xff]   ;;  %v412_v17 = vld [vmem:[#allocation5 + $0x70] sm:$0xff]   ;;  %v415_v19 = vld [vmem:[#allocation5 + $0x78] sm:$0xff]   ;;  %v92_v35 = vsub.s32 1, %v87_v22 }
  0x2c   :  { %v410_v16 = vld [vmem:[#allocation5 + $0x28] sm:$0xff]   ;;  %v413_v18 = vld [vmem:[#allocation5 + $0x30] sm:$0xff]   ;;  %v416_v20 = vld [vmem:[#allocation5 + $0x38] sm:$0xff]  }
  0x2d   :  { %v84_v24 = vld [vmem:[%s572_s2] sm:$0x7]  ;;  %s508_s2 = smov [#allocation7]  }
  0x2e   :  { %v97_v25 = vrot.slane %v84_v24, %v96_v23  ;;  %v89_v36 = vrot.slane %v84_v24, %v88_v34  ;;  %v93_v37 = vrot.slane %v84_v24, %v92_v35  ;;  %s324_s11 = sshll.u32 %s508_s2, 4  ;;  %s325_s11 = int_to_ptr.vmem [resolvable:$true] %s324_s11 }
  0x2f   :  { %s474_s12 = scalar_lea.vmem %s325_s11, 768  ;;  %p479_p3 = scmp.lt.s32.totalorder %s325_s11, %s325_s11 }
  0x30   :  { %p475_p2 = scmp.ne.s32.totalorder %s325_s11, %s474_s12  ;;  %p480_p4 = scmp.lt.s32.totalorder %s474_s12, %s474_s12 }
  0x31   :  { %360 = vmatpush3.bf16.xpose.msra.mxu0 %v401_v4  ;;  %382 = vmatpush3.bf16.xpose.msra.mxu1 %v411_v9 }
  0x32   :  { %361 = vmatprep.subr.bf16.mxu0 %v402_v5  ;;  %383 = vmatprep.subr.bf16.mxu1 %v506_v0  ;;  %p481_p5 = por %p480_p4, %p479_p3 }
  0x34   :  { %p482_p6 = pnand %p481_p5, %p475_p2 }
  0x39   :  { %362 = vmatpush3.bf16.xpose.msra.mxu0 %v403_v7  ;;  %384 = vmatpush3.bf16.xpose.msra.mxu1 %v414_v13 }
  0x3a   :  { %363 = vmatprep.subr.bf16.mxu0 %v404_v8 }
  0x40   :  { %386 = vmatmul.mubr.bf16.vlgmr.msra.gmra.mrb[0].mxu1 %v417_v10 }
  0x41   :  { %364 = vmatpush3.bf16.xpose.msra.mxu0 %v405_v11 }
  0x42   :  { %365 = vmatprep.subr.bf16.mxu0 %v406_v12 }
  0x49   :  { %366 = vmatpush3.bf16.xpose.msra.mxu0 %v407_v14 }
  0x4a   :  { %367 = vmatprep.subr.bf16.mxu0 %v409_v15 }
  0x51   :  { %368 = vmatpush3.bf16.xpose.msra.mxu0 %v410_v16 }
  0x52   :  { %369 = vmatprep.subr.bf16.mxu0 %v412_v17 }
  0x59   :  { %370 = vmatpush3.bf16.xpose.msra.mxu0 %v413_v18 }
  0x5a   :  { %371 = vmatprep.subr.bf16.mxu0 %v415_v19 }
  0x61   :  { %372 = vmatpush3.bf16.xpose.msra.mxu0 %v416_v20 }
  0x68   :  { %374 = vmatmul.mubr.bf16.vlgmr.msra.gmra.mrb[0].mxu0 %v417_v10 }
 0x113   :  { %v298_v26 = vpop.f32.mrb[0].mxu1 }
 0x114   :  { %v299_v27 = vadd.f32 %v298_v26, %v97_v25  ;;  %v387_v28 = vpop.f32.mrb[1].mxu1 }
 0x115   :  { %v301_v29 = vpop.f32.mrb[2].mxu1 }
 0x116   :  { %418 = vtanh.f32 %v299_v27  ;;  %v302_v30 = vadd.f32 %v301_v29, %v97_v25  ;;  %v388_v31 = vpop.f32.mrb[3].mxu1 }
 0x118   :  { %420 = vtanh.f32 %v302_v30 }
 0x120   :  { %v419_v32 = vpop.eup %418 }
 0x121   :  { %314 = vst.msk [vmem:[#allocation7 + $0x10] sm:$0xff] %vm313_vm1, %v419_v32 }
 0x122   :  { %v421_v33 = vpop.eup %420 }
 0x123   :  { %318 = vst.msk [vmem:[#allocation7 + $0x28] sm:$0x3] %vm317_vm2, %v421_v33 }
 0x13b   :  { %v255_v38 = vpop.f32.mrb[0].mxu0 }
 0x13c   :  { %v256_v39 = vadd.f32 %v255_v38, %v89_v36  ;;  %v257_v40 = vpop.f32.mrb[1].mxu0 }
 0x13d   :  { %v258_v41 = vadd.f32 %v257_v40, %v93_v37  ;;  %v259_v42 = vpop.f32.mrb[2].mxu0 }
 0x13e   :  { %422 = vtanh.f32 %v256_v39  ;;  %v260_v43 = vadd.f32 %v259_v42, %v89_v36  ;;  %v261_v44 = vpop.f32.mrb[3].mxu0 }
 0x13f   :  { %424 = vtanh.f32 %v258_v41  ;;  %v262_v45 = vadd.f32 %v261_v44, %v93_v37 }
 0x140   :  { %426 = vtanh.f32 %v260_v43 }
 0x141   :  { %428 = vtanh.f32 %v262_v45 }
 0x148   :  { %v423_v46 = vpop.eup %422 }
 0x149   :  { %v425_v47 = vpop.eup %424  ;;  %311 = vst [vmem:[#allocation7] sm:$0xff] %v423_v46 }
 0x14a   :  { %v427_v48 = vpop.eup %426  ;;  %312 = vst [vmem:[#allocation7 + $0x8] sm:$0xff] %v425_v47 }
 0x14b   :  { %v429_v49 = vpop.eup %428  ;;  %315 = vst [vmem:[#allocation7 + $0x18] sm:$0x3] %v427_v48 }
 0x14c   :  { %316 = vst [vmem:[#allocation7 + $0x20] sm:$0x3] %v429_v49 }
 0x14d   :  { %485 = shalt.err (!%p482_p6)
}
 0x14e   :  { %s486_s15 = scalar_lea.hbm %s573_s3, 768 }
 0x14f   :  { %p487_p7 = scmp.ne.s32.totalorder %s573_s3, %s486_s15  ;;  %p490_p8 = scmp.lt.u32.totalorder %s486_s15, %s573_s3 }
 0x151   :  { %p492_p9 = pnand %p490_p8, %p487_p7 }
 0x153   :  { %495 = shalt.err (!%p492_p9)
}
 0x154   :  { %s509_s20 = smov 384   ;;  %s510_s21 = smov 24  }
 0x155   :  { %330 = dma.vmem_to_hbm [thread:$0]  %s325_s11, 768, %s573_s3, [#allocation4], %s509_s20, %s509_s20, %s510_s21  }
 0x156   :  { %500 = dma.done.wait [#allocation4], 768  }
 0x157   :  { %501 = vsyncadd [#allocation4], 4294966528 }
 0x158   :  { %334 = vsyncpa [#allocation3], 1 }
 0x159   :  { %335 = vsyncpa [#allocation6], 1 }
 0x15a   :  { %336 = vsyncpa [#allocation4], 1 }

</bundles_post_ra>
